<compile_context>
chip_gen: v7x
topology: tpu7x:2x2x1
jax: 0.10.0
libtpu: 0.0.40
codegen_flags: <defaults>
</compile_context>

<pallas_src>
import jax
import jax.numpy as jnp
from jax.experimental import pallas as pl
from jax.experimental.pallas import tpu as pltpu


# ----------------------------------------------------------------------------
# Pallas kernel: one lane-dense MXU matmul per block.
# ----------------------------------------------------------------------------
def _mconv1_kernel(x_ref, w_ref, b_ref, o_ref):
    # x_ref: (CKK, L_blk)  bf16 im2col patch columns (columns = (n, h, w))
    # w_ref: (Cout, CKK)   bf16 fused block-diagonal weights (resident)
    # b_ref: (Cout, 1)     f32 fused bias (resident)
    # o_ref: (Cout, L_blk) lane-dense output block (L_blk >= 128 lanes)
    acc = jnp.dot(w_ref[...], x_ref[...], preferred_element_type=jnp.float32)
    o_ref[...] = (acc + b_ref[...]).astype(o_ref.dtype)


# ----------------------------------------------------------------------------
# Weight fusion helpers (pure JAX, run once in the wrapper).
# ----------------------------------------------------------------------------
def _dense_weight(w, groups, k_target):
    """Grouped (Cout, Cin_g, Kb, Kb) -> dense (Cout, Cin, k_target, k_target).

    The smaller spatial kernel is zero-embedded at the center (so a single
    p = k_target//2 input halo serves every branch) and the grouped channel
    structure is expanded to an explicit block-diagonal pattern.

    NOTE: only ~8% of the fused matrix is non-zero (1/groups from the group
    expansion, plus the zero-embedded 5x5 / 1x1 taps).  At Cin_g=2 this is
    still the right call for the MXU; revisit (e.g. split the k=7 branch)
    if channel counts grow and the kernel becomes compute-bound.
    """
    cout, cin_g, kb, _ = w.shape
    g = groups
    cout_g = cout // g
    pad = (k_target - kb) // 2
    w = jnp.pad(w, ((0, 0), (0, 0), (pad, pad), (pad, pad)))
    w = w.reshape(g, cout_g, cin_g, k_target, k_target)
    eye = jnp.eye(g, dtype=w.dtype)
    dense = w[:, :, None] * eye[:, None, :, None, None, None]
    # (g, cout_g, g, cin_g, K, K) -> (Cout, Cin, K, K)
    return dense.reshape(cout, g * cin_g, k_target, k_target)


def _pick_lane_tile(l, max_lanes):
    """Largest multiple-of-128 tile <= max_lanes that divides l (or None)."""
    for t in (2048, 1024, 512, 384, 256, 128):
        if t <= max_lanes and l % t == 0:
            return t
    return None


# ----------------------------------------------------------------------------
# MConv1 forward: fused pallas_call (single matmul by default).
# ----------------------------------------------------------------------------
def mconv1_forward(x, params, *, groups=8, out_dtype=jnp.float32,
                   max_lanes_per_block=2048):
    (w1, b1), (w2, b2), (w3, b3) = params
    N, Cin, H, W = x.shape
    K = max(w1.shape[-1], w2.shape[-1], w3.shape[-1])      # 7
    p = K // 2

    # Fused dense weight (Cout, Cin*K*K) and bias (Cout, 1).
    w_dense = jnp.concatenate(
        [_dense_weight(w1, groups, K),
         _dense_weight(w2, groups, K),
         _dense_weight(w3, groups, K)], axis=0)
    Cout = w_dense.shape[0]
    CKK = Cin * K * K
    HW = H * W
    L = N * HW

    w_flat = w_dense.reshape(Cout, CKK).astype(jnp.bfloat16)
    b_all = jnp.concatenate([b1, b2, b3]).reshape(Cout, 1).astype(jnp.float32)

    # ---- im2col: one fused XLA op on a bf16 input (no f32 49x intermediate).
    # Output channel order of conv_general_dilated_patches is (c, kh, kw),
    # matching the (Cout, Cin, K, K) -> (Cout, Cin*K*K) weight flatten above.
    # TODO(synk): for production H*W / Cin, move the patch build into the
    # kernel (BlockSpec the padded tile + VMEM scratch) to cut HBM traffic.
    xb = x.astype(jnp.bfloat16)
    patches = jax.lax.conv_general_dilated_patches(
        xb, filter_shape=(K, K), window_strides=(1, 1),
        padding=[(p, p), (p, p)],
        dimension_numbers=("NCHW", "OIHW", "NCHW"))        # (N, CKK, H, W)
    patches = jnp.moveaxis(patches.reshape(N, CKK, HW), 0, 1)
    patches = patches.reshape(CKK, L)                       # columns = (n, h, w)

    out_bytes = jnp.dtype(out_dtype).itemsize
    cost = pl.CostEstimate(
        flops=2 * Cout * CKK * L,
        transcendentals=0,
        bytes_accessed=(CKK * L * 2 + Cout * CKK * 2
                        + Cout * 4 + Cout * L * out_bytes))

    tile = None
    if L > max_lanes_per_block:
        tile = _pick_lane_tile(L, max_lanes_per_block)
        # TODO(synk): if no divisor tile exists, pad L up to a multiple of 128.

    if tile is None:
        # Default path: one fat (Cout, CKK) x (CKK, L) matmul, no grid.
        # No pipeline => all operands single-buffered, weights resident.
        out = pl.pallas_call(
            _mconv1_kernel,
            out_shape=jax.ShapeDtypeStruct((Cout, L), out_dtype),
            cost_estimate=cost,
        )(patches, w_flat, b_all)
    else:
        # Lane-tiled path for large N*H*W: bounds per-step VMEM; columns are
        # independent so the axis is "parallel" (v7x can split across cores
        # while each core's store stays lane-dense).
        # NOTE: once the fused weight grows, mark the w/b specs
        # pipeline_mode=pl.Buffered(1) to avoid double-buffering residents.
        out = pl.pallas_call(
            _mconv1_kernel,
            out_shape=jax.ShapeDtypeStruct((Cout, L), out_dtype),
            grid_spec=pltpu.PrefetchScalarGridSpec(
                num_scalar_prefetch=0,
                grid=(L // tile,),
                in_specs=[
                    pl.BlockSpec((CKK, tile), lambda j: (0, j)),
                    pl.BlockSpec((Cout, CKK), lambda j: (0, 0)),   # resident
                    pl.BlockSpec((Cout, 1), lambda j: (0, 0)),     # resident
                ],
                out_specs=pl.BlockSpec((Cout, tile), lambda j: (0, j)),
            ),
            compiler_params=pltpu.CompilerParams(
                dimension_semantics=("parallel",)),
            cost_estimate=cost,
        )(patches, w_flat, b_all)

    # Cheap relayout back to NCHW (131 KB here; XLA fuses it with consumers).
    out = out.reshape(Cout, N, H, W)
    return jnp.transpose(out, (1, 0, 2, 3))


# ----------------------------------------------------------------------------
# Pure-JAX reference (lax grouped conv, f32 HIGHEST) for the correctness check.
# ----------------------------------------------------------------------------
def _ref_grouped_conv(x, w, b, groups):
    K = w.shape[-1]
    p = K // 2
    out = jax.lax.conv_general_dilated(
        x, w, window_strides=(1, 1),
        padding=[(p, p), (p, p)],
        dimension_numbers=("NCHW", "OIHW", "NCHW"),
        feature_group_count=groups,
        precision=jax.lax.Precision.HIGHEST)
    return out + b[None, :, None, None]


def _ref_forward(x, params, groups=8):
    (w1, b1), (w2, b2), (w3, b3) = params
    return jnp.concatenate(
        (_ref_grouped_conv(x, w1, b1, groups),
         _ref_grouped_conv(x, w2, b2, groups),
         _ref_grouped_conv(x, w3, b3, groups)), axis=1)


if __name__ == "__main__":
    key = jax.random.PRNGKey(0)
    ks = jax.random.split(key, 7)

    # Small shapes consistent with the module: in_channels divisible by 8.
    N, Cin, H, W = 2, 16, 16, 16
    groups = 8

    x = jax.random.normal(ks[0], (N, Cin, H, W), jnp.float32)

    # Deterministic synthetic parameters (shapes per nn.Conv2d in __init__).
    w1 = 0.1 * jax.random.normal(ks[1], (32, Cin // groups, 7, 7), jnp.float32)
    b1 = 0.1 * jax.random.normal(ks[2], (32,), jnp.float32)
    w2 = 0.1 * jax.random.normal(ks[3], (16, Cin // groups, 5, 5), jnp.float32)
    b2 = 0.1 * jax.random.normal(ks[4], (16,), jnp.float32)
    w3 = 0.1 * jax.random.normal(ks[5], (16, Cin // groups, 1, 1), jnp.float32)
    b3 = 0.1 * jax.random.normal(ks[6], (16,), jnp.float32)

    params = ((w1, b1), (w2, b2), (w3, b3))

    ref = jax.block_until_ready(_ref_forward(x, params, groups=groups))

    # Default path: single fused matmul, no grid (N merged into the lanes).
    fwd = jax.jit(lambda xx, pp: mconv1_forward(xx, pp, groups=groups))
    out = jax.block_until_ready(fwd(x, params))
    assert out.shape == (N, 64, H, W), out.shape
    # Tolerance loosened vs. the f32 HIGHEST reference because the kernel
    # feeds the MXU bf16 operands (f32 accumulation + f32 bias).
    assert jnp.allclose(out, ref, atol=2e-2, rtol=2e-2), (
        float(jnp.max(jnp.abs(out - ref))))

    # Lane-tiled path (scaling / v7x split): force 256-lane tiles -> grid=(2,).
    fwd_tiled = jax.jit(
        lambda xx, pp: mconv1_forward(xx, pp, groups=groups,
                                      max_lanes_per_block=256))
    out_t = jax.block_until_ready(fwd_tiled(x, params))
    assert out_t.shape == (N, 64, H, W), out_t.shape
    assert jnp.allclose(out_t, ref, atol=2e-2, rtol=2e-2), (
        float(jnp.max(jnp.abs(out_t - ref))))

    print("KERNEL_OK")
</pallas_src>

<mosaic_0001>
module attributes {stable_mosaic.version = 11 : i64} {
  func.func @_mconv1_kernel(%arg0: memref<784x512xbf16, #tpu.memory_space<vmem>>, %arg1: memref<64x784xbf16, #tpu.memory_space<vmem>>, %arg2: memref<64x1xf32, #tpu.memory_space<vmem>>, %arg3: memref<64x512xf32, #tpu.memory_space<vmem>>) attributes {dimension_semantics = [], scalar_prefetch = 0 : i64, scratch_operands = 0 : i64, tpu.core_type = #tpu.core_type<tc>} {
    %c0 = arith.constant 0 : index
    %c0_0 = arith.constant 0 : index
    %0 = vector.load %arg1[%c0, %c0_0] : memref<64x784xbf16, #tpu.memory_space<vmem>>, vector<64x784xbf16>
    %c0_1 = arith.constant 0 : index
    %c0_2 = arith.constant 0 : index
    %1 = vector.load %arg0[%c0_1, %c0_2] : memref<784x512xbf16, #tpu.memory_space<vmem>>, vector<784x512xbf16>
    %cst = arith.constant dense<0.000000e+00> : vector<64x512xf32>
    %2 = tpu.matmul %0, %1, %cst {dimension_numbers = #tpu.dot_dimension_numbers<[1], [0], [0], [1], [0, 0, 1, 1], [], []>} : vector<64x784xbf16>, vector<784x512xbf16>, vector<64x512xf32> -> vector<64x512xf32>
    %c0_3 = arith.constant 0 : index
    %c0_4 = arith.constant 0 : index
    %3 = vector.load %arg2[%c0_3, %c0_4] : memref<64x1xf32, #tpu.memory_space<vmem>>, vector<64x1xf32>
    %4 = vector.broadcast %3 : vector<64x1xf32> to vector<64x512xf32>
    %5 = arith.addf %2, %4 : vector<64x512xf32>
    %c0_5 = arith.constant 0 : index
    %c0_6 = arith.constant 0 : index
    %6 = vector.load %arg3[%c0_5, %c0_6] : memref<64x512xf32, #tpu.memory_space<vmem>>, vector<64x512xf32>
    tpu.vector_store %arg3[%c0_5, %c0_6], %5 {strides = array<i32>} : memref<64x512xf32, #tpu.memory_space<vmem>>, vector<64x512xf32>,
    return
  }
}

</mosaic_0001>

<bundles_post_ra>
// kernel: _lambda_.1
= control target key start
LH: loop header
LB: loop body
LE: loop exit
PB: predicated region body
PF: predicated region fallthrough
CT: control target
= control target key end

     0   :  { %vm1411_vm0 = vcmask 130048   ;;  %s3572_s0 = inlined_call_operand.vmem [shape: bf16[784,512], index: 0, kind: input, shape index: {}]   ;;  %s3573_s1 = inlined_call_operand.vmem [shape: bf16[64,784], index: 1, kind: input, shape index: {}]   ;;  %s3574_s2 = inlined_call_operand.vmem [shape: f32[64,1], index: 2, kind: input, shape index: {}]   ;;  %s3575_s3 = inlined_call_operand.vmem [shape: f32[64,512], index: 3, kind: output, shape index: {}]  }
   0x1   :  { %v2407_v0 = vld [vmem:[%s3572_s0 + $0x4] ss:$16 sps:$4 sm:$0xff]   ;;  %v2409_v1 = vld [vmem:[%s3572_s0 + $0xc] ss:$16 sps:$4 sm:$0xff]   ;;  %v2411_v2 = vld [vmem:[%s3572_s0] ss:$16 sps:$4 sm:$0xff]  }
   0x2   :  { %1424 = vmatprep.subr.bf16.mxu0 %v2407_v0  ;;  %v2412_v3 = vld [vmem:[%s3572_s0 + $0x8] ss:$16 sps:$4 sm:$0xff]   ;;  %1716 = vmatprep.subr.bf16.mxu1 %v2409_v1  ;;  %v2413_v4 = vld [vmem:[%s3572_s0 + $0x24] ss:$16 sps:$4 sm:$0xff]   ;;  %v2415_v5 = vld [vmem:[%s3572_s0 + $0x2c] ss:$16 sps:$4 sm:$0xff]  }
   0x3   :  { %1425 = vmatpush1.bf16.msra.mxu0 %v2411_v2  ;;  %1717 = vmatpush1.bf16.msra.mxu1 %v2412_v3  ;;  %v2417_v6 = vld [vmem:[%s3572_s0 + $0x20] ss:$16 sps:$4 sm:$0xff]   ;;  %v2418_v7 = vld [vmem:[%s3572_s0 + $0x28] ss:$16 sps:$4 sm:$0xff]   ;;  %v2419_v8 = vld [vmem:[%s3572_s0 + $0x44] ss:$16 sps:$4 sm:$0xff]  }
   0x4   :  { %1426 = vmatprep.subr.bf16.mxu0 %v2413_v4  ;;  %1718 = vmatprep.subr.bf16.mxu1 %v2415_v5  ;;  %v2421_v9 = vld [vmem:[%s3572_s0 + $0x4c] ss:$16 sps:$4 sm:$0xff]   ;;  %v2423_v10 = vld [vmem:[%s3572_s0 + $0x40] ss:$16 sps:$4 sm:$0xff]   ;;  %v2424_v11 = vld [vmem:[%s3572_s0 + $0x48] ss:$16 sps:$4 sm:$0xff]  }
   0x5   :  { %v2425_v12 = vld [vmem:[%s3572_s0 + $0x64] ss:$16 sps:$4 sm:$0xff]   ;;  %v2427_v13 = vld [vmem:[%s3572_s0 + $0x6c] ss:$16 sps:$4 sm:$0xff]   ;;  %v2429_v14 = vld [vmem:[%s3572_s0 + $0x60] ss:$16 sps:$4 sm:$0xff]  }
   0x6   :  { %v2430_v15 = vld [vmem:[%s3572_s0 + $0x68] ss:$16 sps:$4 sm:$0xff]   ;;  %v2431_v16 = vld [vmem:[%s3572_s0 + $0x84] ss:$16 sps:$4 sm:$0xff]   ;;  %v2433_v17 = vld [vmem:[%s3572_s0 + $0x8c] ss:$16 sps:$4 sm:$0xff]  }
   0x7   :  { %1427 = vmatpush1.bf16.msra.mxu0 %v2417_v6  ;;  %1719 = vmatpush1.bf16.msra.mxu1 %v2418_v7  ;;  %v2435_v18 = vld [vmem:[%s3572_s0 + $0x80] ss:$16 sps:$4 sm:$0xff]   ;;  %v2436_v19 = vld [vmem:[%s3572_s0 + $0x88] ss:$16 sps:$4 sm:$0xff]   ;;  %v2437_v20 = vld [vmem:[%s3572_s0 + $0xa4] ss:$16 sps:$4 sm:$0xff]  }
   0x8   :  { %1428 = vmatprep.subr.bf16.mxu0 %v2419_v8  ;;  %1720 = vmatprep.subr.bf16.mxu1 %v2421_v9  ;;  %v2439_v21 = vld [vmem:[%s3572_s0 + $0xac] ss:$16 sps:$4 sm:$0xff]   ;;  %v2441_v22 = vld [vmem:[%s3572_s0 + $0xa0] ss:$16 sps:$4 sm:$0xff]   ;;  %v2442_v23 = vld [vmem:[%s3572_s0 + $0xa8] ss:$16 sps:$4 sm:$0xff]  }
   0x9   :  { %v2443_v24 = vld [vmem:[%s3572_s0 + $0xc4] ss:$16 sps:$4 sm:$0xff]   ;;  %v2445_v25 = vld [vmem:[%s3572_s0 + $0xcc] ss:$16 sps:$4 sm:$0xff]   ;;  %v2447_v26 = vld [vmem:[%s3572_s0 + $0xc0] ss:$16 sps:$4 sm:$0xff]  }
   0xa   :  { %v2448_v27 = vld [vmem:[%s3572_s0 + $0xc8] ss:$16 sps:$4 sm:$0xff]   ;;  %v2449_v28 = vld [vmem:[%s3572_s0 + $0xe4] ss:$16 sps:$4 sm:$0xff]   ;;  %v2451_v29 = vld [vmem:[%s3572_s0 + $0xec] ss:$16 sps:$4 sm:$0xff]  }
   0xb   :  { %1429 = vmatpush1.bf16.msra.mxu0 %v2423_v10  ;;  %1721 = vmatpush1.bf16.msra.mxu1 %v2424_v11  ;;  %v2453_v30 = vld [vmem:[%s3572_s0 + $0xe0] ss:$16 sps:$4 sm:$0xff]   ;;  %v2454_v31 = vld [vmem:[%s3572_s0 + $0xe8] ss:$16 sps:$4 sm:$0xff]   ;;  %v2455_v32 = vld [vmem:[%s3572_s0 + $0x104] ss:$16 sps:$4 sm:$0xff]  }
   0xc   :  { %1430 = vmatprep.subr.bf16.mxu0 %v2425_v12  ;;  %1722 = vmatprep.subr.bf16.mxu1 %v2427_v13  ;;  %v2457_v33 = vld [vmem:[%s3572_s0 + $0x10c] ss:$16 sps:$4 sm:$0xff]   ;;  %v2459_v34 = vld [vmem:[%s3572_s0 + $0x100] ss:$16 sps:$4 sm:$0xff]   ;;  %v2460_v35 = vld [vmem:[%s3572_s0 + $0x108] ss:$16 sps:$4 sm:$0xff]  }
   0xd   :  { %v2461_v36 = vld [vmem:[%s3572_s0 + $0x124] ss:$16 sps:$4 sm:$0xff]   ;;  %v2463_v37 = vld [vmem:[%s3572_s0 + $0x12c] ss:$16 sps:$4 sm:$0xff]   ;;  %v2465_v38 = vld [vmem:[%s3572_s0 + $0x120] ss:$16 sps:$4 sm:$0xff]  }
   0xe   :  { %v2466_v39 = vld [vmem:[%s3572_s0 + $0x128] ss:$16 sps:$4 sm:$0xff]   ;;  %v2467_v40 = vld [vmem:[%s3572_s0 + $0x144] ss:$16 sps:$4 sm:$0xff]   ;;  %v2469_v41 = vld [vmem:[%s3572_s0 + $0x14c] ss:$16 sps:$4 sm:$0xff]  }
   0xf   :  { %1431 = vmatpush1.bf16.msra.mxu0 %v2429_v14  ;;  %1723 = vmatpush1.bf16.msra.mxu1 %v2430_v15  ;;  %v2471_v42 = vld [vmem:[%s3572_s0 + $0x140] ss:$16 sps:$4 sm:$0xff]   ;;  %v2472_v43 = vld [vmem:[%s3572_s0 + $0x148] ss:$16 sps:$4 sm:$0xff]   ;;  %v2473_v44 = vld [vmem:[%s3572_s0 + $0x164] ss:$16 sps:$4 sm:$0xff]  }
  0x10   :  { %1432 = vmatprep.subr.bf16.mxu0 %v2431_v16  ;;  %1724 = vmatprep.subr.bf16.mxu1 %v2433_v17  ;;  %v2475_v45 = vld [vmem:[%s3572_s0 + $0x16c] ss:$16 sps:$4 sm:$0xff]   ;;  %v2477_v46 = vld [vmem:[%s3572_s0 + $0x160] ss:$16 sps:$4 sm:$0xff]   ;;  %v2478_v47 = vld [vmem:[%s3572_s0 + $0x168] ss:$16 sps:$4 sm:$0xff]  }
  0x11   :  { %v2505_v48 = vld [vmem:[%s3573_s1 + $0x4] ss:$28 sps:$4 sm:$0xff]   ;;  %v2481_v50 = vld [vmem:[%s3572_s0 + $0x18c] ss:$16 sps:$4 sm:$0xff]   ;;  %v2484_v52 = vld [vmem:[%s3572_s0 + $0x188] ss:$16 sps:$4 sm:$0xff]  }
  0x12   :  { %v2479_v49 = vld [vmem:[%s3572_s0 + $0x184] ss:$16 sps:$4 sm:$0xff]   ;;  %1456 = vmatprep.mubr.bf16.mxu0 %v2505_v48  ;;  %1748 = vmatprep.mubr.bf16.mxu1 %v2505_v48  ;;  %v2483_v51 = vld [vmem:[%s3572_s0 + $0x180] ss:$16 sps:$4 sm:$0xff]   ;;  %v2487_v54 = vld [vmem:[%s3572_s0 + $0x1ac] ss:$16 sps:$4 sm:$0xff]  }
  0x13   :  { %1433 = vmatpush1.bf16.msra.mxu0 %v2435_v18  ;;  %1725 = vmatpush1.bf16.msra.mxu1 %v2436_v19  ;;  %v2485_v53 = vld [vmem:[%s3572_s0 + $0x1a4] ss:$16 sps:$4 sm:$0xff]   ;;  %v2489_v55 = vld [vmem:[%s3572_s0 + $0x1a0] ss:$16 sps:$4 sm:$0xff]   ;;  %v2490_v56 = vld [vmem:[%s3572_s0 + $0x1a8] ss:$16 sps:$4 sm:$0xff]  }
  0x14   :  { %1434 = vmatprep.subr.bf16.mxu0 %v2437_v20  ;;  %1726 = vmatprep.subr.bf16.mxu1 %v2439_v21  ;;  %v2491_v57 = vld [vmem:[%s3572_s0 + $0x1c4] ss:$16 sps:$4 sm:$0xff]   ;;  %v2493_v58 = vld [vmem:[%s3572_s0 + $0x1cc] ss:$16 sps:$4 sm:$0xff]   ;;  %v2495_v59 = vld [vmem:[%s3572_s0 + $0x1c0] ss:$16 sps:$4 sm:$0xff]  }
  0x15   :  { %v2496_v60 = vld [vmem:[%s3572_s0 + $0x1c8] ss:$16 sps:$4 sm:$0xff]   ;;  %v2497_v61 = vld [vmem:[%s3572_s0 + $0x1e4] ss:$16 sps:$4 sm:$0xff]   ;;  %v2499_v62 = vld [vmem:[%s3572_s0 + $0x1ec] ss:$16 sps:$4 sm:$0xff]  }
  0x16   :  { %v2501_v63 = vld [vmem:[%s3572_s0 + $0x1e0] ss:$16 sps:$4 sm:$0xff]   ;;  %v2502_v0 = vld [vmem:[%s3572_s0 + $0x1e8] ss:$16 sps:$4 sm:$0xff]   ;;  %v2508_v1 = vld [vmem:[%s3572_s0 + $0x204] ss:$16 sps:$4 sm:$0xff]  }
  0x17   :  { %1435 = vmatpush1.bf16.msra.mxu0 %v2441_v22  ;;  %1727 = vmatpush1.bf16.msra.mxu1 %v2442_v23  ;;  %v2511_v2 = vld [vmem:[%s3572_s0 + $0x20c] ss:$16 sps:$4 sm:$0xff]   ;;  %v2506_v4 = vld [vmem:[%s3572_s0 + $0x200] ss:$16 sps:$4 sm:$0xff]   ;;  %v2509_v5 = vld [vmem:[%s3572_s0 + $0x208] ss:$16 sps:$4 sm:$0xff]  }
  0x18   :  { %1436 = vmatprep.subr.bf16.mxu0 %v2443_v24  ;;  %1728 = vmatprep.subr.bf16.mxu1 %v2445_v25  ;;  %v2503_v3 = vld [vmem:[%s3573_s1] ss:$28 sps:$4 sm:$0xff]   ;;  %v2514_v6 = vld [vmem:[%s3572_s0 + $0x224] ss:$16 sps:$4 sm:$0xff]   ;;  %v2515_v9 = vld [vmem:[%s3572_s0 + $0x228] ss:$16 sps:$4 sm:$0xff]  }
  0x19   :  { %v2517_v7 = vld [vmem:[%s3572_s0 + $0x22c] ss:$16 sps:$4 sm:$0xff]   ;;  %v2512_v8 = vld [vmem:[%s3572_s0 + $0x220] ss:$16 sps:$4 sm:$0xff]   ;;  %v2520_v10 = vld [vmem:[%s3572_s0 + $0x244] ss:$16 sps:$4 sm:$0xff]  }
  0x1a   :  { %v2523_v11 = vld [vmem:[%s3572_s0 + $0x24c] ss:$16 sps:$4 sm:$0xff]   ;;  %v2518_v12 = vld [vmem:[%s3572_s0 + $0x240] ss:$16 sps:$4 sm:$0xff]   ;;  %v2521_v14 = vld [vmem:[%s3572_s0 + $0x248] ss:$16 sps:$4 sm:$0xff]  }
  0x1b   :  { %1437 = vmatpush1.bf16.msra.mxu0 %v2447_v26  ;;  %1729 = vmatpush1.bf16.msra.mxu1 %v2448_v27  ;;  %v2566_v13 = vld [vmem:[%s3573_s1 + $0x3c] ss:$28 sps:$4 sm:$0xff]   ;;  %v2526_v15 = vld [vmem:[%s3572_s0 + $0x264] ss:$16 sps:$4 sm:$0xff]   ;;  %v2524_v18 = vld [vmem:[%s3572_s0 + $0x260] ss:$16 sps:$4 sm:$0xff]  }
  0x1c   :  { %1438 = vmatprep.subr.bf16.mxu0 %v2449_v28  ;;  %1730 = vmatprep.subr.bf16.mxu1 %v2451_v29  ;;  %v2529_v16 = vld [vmem:[%s3572_s0 + $0x26c] ss:$16 sps:$4 sm:$0xff]   ;;  %v2574_v17 = vld [vmem:[%s3573_s1 + $0x38] ss:$28 sps:$4 sm:$0xff]   ;;  %v2530_v23 = vld [vmem:[%s3572_s0 + $0x280] ss:$16 sps:$4 sm:$0xff]  }
  0x1d   :  { %v2527_v19 = vld [vmem:[%s3572_s0 + $0x268] ss:$16 sps:$4 sm:$0xff]   ;;  %v2532_v20 = vld [vmem:[%s3572_s0 + $0x284] ss:$16 sps:$4 sm:$0xff]   ;;  %v2535_v21 = vld [vmem:[%s3572_s0 + $0x28c] ss:$16 sps:$4 sm:$0xff]  }
  0x1e   :  { %v2581_v22 = vld [vmem:[%s3573_s1 + $0x74] ss:$28 sps:$4 sm:$0xff]   ;;  %v2533_v24 = vld [vmem:[%s3572_s0 + $0x288] ss:$16 sps:$4 sm:$0xff]   ;;  %v2541_v26 = vld [vmem:[%s3572_s0 + $0x2ac] ss:$16 sps:$4 sm:$0xff]  }
  0x1f   :  { %1439 = vmatpush1.bf16.msra.mxu0 %v2453_v30  ;;  %1731 = vmatpush1.bf16.msra.mxu1 %v2454_v31  ;;  %v2538_v25 = vld [vmem:[%s3572_s0 + $0x2a4] ss:$16 sps:$4 sm:$0xff]   ;;  %v2536_v27 = vld [vmem:[%s3572_s0 + $0x2a0] ss:$16 sps:$4 sm:$0xff]   ;;  %v2539_v29 = vld [vmem:[%s3572_s0 + $0x2a8] ss:$16 sps:$4 sm:$0xff]  }
  0x20   :  { %1440 = vmatprep.subr.bf16.mxu0 %v2455_v32  ;;  %1732 = vmatprep.subr.bf16.mxu1 %v2457_v33  ;;  %v2589_v28 = vld [vmem:[%s3573_s1 + $0x70] ss:$28 sps:$4 sm:$0xff]   ;;  %v2544_v30 = vld [vmem:[%s3572_s0 + $0x2c4] ss:$16 sps:$4 sm:$0xff]  }
  0x21   :  { %v2596_v31 = vld [vmem:[%s3573_s1 + $0xac] ss:$28 sps:$4 sm:$0xff]   ;;  %v2542_v33 = vld [vmem:[%s3572_s0 + $0x2c0] ss:$16 sps:$4 sm:$0xff]  }
  0x22   :  { %v2547_v32 = vld [vmem:[%s3572_s0 + $0x2cc] ss:$16 sps:$4 sm:$0xff]   ;;  %v2560_v48 = vld [vmem:[%s3572_s0 + $0x320] ss:$16 sps:$4 sm:$0xff]  }
  0x23   :  { %1441 = vmatpush1.bf16.msra.mxu0 %v2459_v34  ;;  %1733 = vmatpush1.bf16.msra.mxu1 %v2460_v35  ;;  %v2545_v34 = vld [vmem:[%s3572_s0 + $0x2c8] ss:$16 sps:$4 sm:$0xff]   ;;  %v2550_v35 = vld [vmem:[%s3572_s0 + $0x2e4] ss:$16 sps:$4 sm:$0xff]  }
  0x24   :  { %1442 = vmatprep.subr.bf16.mxu0 %v2461_v36  ;;  %1734 = vmatprep.subr.bf16.mxu1 %v2463_v37  ;;  %v2553_v36 = vld [vmem:[%s3572_s0 + $0x2ec] ss:$16 sps:$4 sm:$0xff]   ;;  %v2548_v37 = vld [vmem:[%s3572_s0 + $0x2e0] ss:$16 sps:$4 sm:$0xff]  }
  0x27   :  { %1443 = vmatpush1.bf16.msra.mxu0 %v2465_v38  ;;  %1735 = vmatpush1.bf16.msra.mxu1 %v2466_v39  ;;  %v2604_v38 = vld [vmem:[%s3573_s1 + $0xa8] ss:$28 sps:$4 sm:$0xff]  }
  0x28   :  { %1444 = vmatprep.subr.bf16.mxu0 %v2467_v40  ;;  %1736 = vmatprep.subr.bf16.mxu1 %v2469_v41  ;;  %v2551_v39 = vld [vmem:[%s3572_s0 + $0x2e8] ss:$16 sps:$4 sm:$0xff]   ;;  %v2556_v41 = vld [vmem:[%s3572_s0 + $0x304] ss:$16 sps:$4 sm:$0xff]  }
  0x29   :  { %v2613_v40 = vld [vmem:[%s3573_s1 + $0xc] ss:$28 sps:$4 sm:$0xff]  }
  0x2b   :  { %1445 = vmatpush1.bf16.msra.mxu0 %v2471_v42  ;;  %1737 = vmatpush1.bf16.msra.mxu1 %v2472_v43  ;;  %v2559_v42 = vld [vmem:[%s3572_s0 + $0x30c] ss:$16 sps:$4 sm:$0xff]   ;;  %v2554_v43 = vld [vmem:[%s3572_s0 + $0x300] ss:$16 sps:$4 sm:$0xff]  }
  0x2c   :  { %1446 = vmatprep.subr.bf16.mxu0 %v2473_v44  ;;  %1738 = vmatprep.subr.bf16.mxu1 %v2475_v45  ;;  %v2557_v44 = vld [vmem:[%s3572_s0 + $0x308] ss:$16 sps:$4 sm:$0xff]   ;;  %v2562_v45 = vld [vmem:[%s3572_s0 + $0x324] ss:$16 sps:$4 sm:$0xff]  }
  0x2f   :  { %1447 = vmatpush1.bf16.msra.mxu0 %v2477_v46  ;;  %1739 = vmatpush1.bf16.msra.mxu1 %v2478_v47  ;;  %v2565_v46 = vld [vmem:[%s3572_s0 + $0x32c] ss:$16 sps:$4 sm:$0xff]   ;;  %v2741_v47 = vmov 0  }
  0x30   :  { %1448 = vmatprep.subr.bf16.mxu0 %v2479_v49  ;;  %1740 = vmatprep.subr.bf16.mxu1 %v2481_v50  ;;  %v2563_v49 = vld [vmem:[%s3572_s0 + $0x328] ss:$16 sps:$4 sm:$0xff]   ;;  %v2570_v50 = vld [vmem:[%s3572_s0 + $0x344] ss:$16 sps:$4 sm:$0xff]  }
  0x31   :  { %2405 = vset.pattern.permute.xlu0 %v2741_v47  ;;  %2406 = vset.pattern.permute.xlu1 %v2741_v47 }
  0x33   :  { %1449 = vmatpush1.bf16.msra.mxu0 %v2483_v51  ;;  %1741 = vmatpush1.bf16.msra.mxu1 %v2484_v52  ;;  %v2573_v51 = vld [vmem:[%s3572_s0 + $0x34c] ss:$16 sps:$4 sm:$0xff]   ;;  %v2568_v52 = vld [vmem:[%s3572_s0 + $0x340] ss:$16 sps:$4 sm:$0xff]  }
  0x34   :  { %1450 = vmatprep.subr.bf16.mxu0 %v2485_v53  ;;  %1742 = vmatprep.subr.bf16.mxu1 %v2487_v54  ;;  %v2571_v53 = vld [vmem:[%s3572_s0 + $0x348] ss:$16 sps:$4 sm:$0xff]   ;;  %v2577_v54 = vld [vmem:[%s3572_s0 + $0x364] ss:$16 sps:$4 sm:$0xff]  }
  0x37   :  { %1451 = vmatpush1.bf16.msra.mxu0 %v2489_v55  ;;  %1743 = vmatpush1.bf16.msra.mxu1 %v2490_v56  ;;  %v2580_v55 = vld [vmem:[%s3572_s0 + $0x36c] ss:$16 sps:$4 sm:$0xff]   ;;  %v2575_v56 = vld [vmem:[%s3572_s0 + $0x360] ss:$16 sps:$4 sm:$0xff]  }
  0x38   :  { %1452 = vmatprep.subr.bf16.mxu0 %v2491_v57  ;;  %1744 = vmatprep.subr.bf16.mxu1 %v2493_v58  ;;  %v2578_v57 = vld [vmem:[%s3572_s0 + $0x368] ss:$16 sps:$4 sm:$0xff]   ;;  %v2585_v58 = vld [vmem:[%s3572_s0 + $0x384] ss:$16 sps:$4 sm:$0xff]  }
  0x3b   :  { %1453 = vmatpush1.bf16.msra.mxu0 %v2495_v59  ;;  %1745 = vmatpush1.bf16.msra.mxu1 %v2496_v60  ;;  %v2588_v59 = vld [vmem:[%s3572_s0 + $0x38c] ss:$16 sps:$4 sm:$0xff]   ;;  %v2583_v60 = vld [vmem:[%s3572_s0 + $0x380] ss:$16 sps:$4 sm:$0xff]  }
  0x3c   :  { %1454 = vmatprep.subr.bf16.mxu0 %v2497_v61  ;;  %1746 = vmatprep.subr.bf16.mxu1 %v2499_v62  ;;  %v2586_v61 = vld [vmem:[%s3572_s0 + $0x388] ss:$16 sps:$4 sm:$0xff]   ;;  %v2592_v62 = vld [vmem:[%s3572_s0 + $0x3a4] ss:$16 sps:$4 sm:$0xff]  }
  0x3f   :  { %1455 = vmatpush1.bf16.msra.mxu0 %v2501_v63  ;;  %1747 = vmatpush1.bf16.msra.mxu1 %v2502_v0  ;;  %v2595_v63 = vld [vmem:[%s3572_s0 + $0x3ac] ss:$16 sps:$4 sm:$0xff]   ;;  %v2590_v0 = vld [vmem:[%s3572_s0 + $0x3a0] ss:$16 sps:$4 sm:$0xff]  }
  0x40   :  { %1497 = vmatprep.subr.bf16.mxu0 %v2508_v1  ;;  %1789 = vmatprep.subr.bf16.mxu1 %v2511_v2  ;;  %v2593_v1 = vld [vmem:[%s3572_s0 + $0x3a8] ss:$16 sps:$4 sm:$0xff]   ;;  %v2600_v2 = vld [vmem:[%s3572_s0 + $0x3c4] ss:$16 sps:$4 sm:$0xff]  }
  0x42   :  { %1457 = vmatmul.mubr.bf16.vlgmr.msra.gmra.mrb[0].mxu0 %v2503_v3  ;;  %1749 = vmatmul.mubr.bf16.vlgmr.msra.gmra.mrb[0].mxu1 %v2503_v3  ;;  %v2603_v3 = vld [vmem:[%s3572_s0 + $0x3cc] ss:$16 sps:$4 sm:$0xff]  }
  0x43   :  { %1498 = vmatpush1.bf16.msra.mxu0 %v2506_v4  ;;  %1790 = vmatpush1.bf16.msra.mxu1 %v2509_v5  ;;  %v2598_v4 = vld [vmem:[%s3572_s0 + $0x3c0] ss:$16 sps:$4 sm:$0xff]   ;;  %v2601_v5 = vld [vmem:[%s3572_s0 + $0x3c8] ss:$16 sps:$4 sm:$0xff]  }
  0x44   :  { %1499 = vmatprep.subr.bf16.mxu0 %v2514_v6  ;;  %1791 = vmatprep.subr.bf16.mxu1 %v2517_v7  ;;  %v2607_v6 = vld [vmem:[%s3572_s0 + $0x3e4] ss:$16 sps:$4 sm:$0xff]   ;;  %v2610_v7 = vld [vmem:[%s3572_s0 + $0x3ec] ss:$16 sps:$4 sm:$0xff]  }
  0x45   :  { %1466 = vmatprep.mubr.bf16.mxu0 %v2566_v13  ;;  %1758 = vmatprep.mubr.bf16.mxu1 %v2566_v13  ;;  %v2614_v13 = vld [vmem:[%s3572_s0 + $0x400] ss:$16 sps:$4 sm:$0xff]  }
  0x47   :  { %1500 = vmatpush1.bf16.msra.mxu0 %v2512_v8  ;;  %1792 = vmatpush1.bf16.msra.mxu1 %v2515_v9  ;;  %v2605_v8 = vld [vmem:[%s3572_s0 + $0x3e0] ss:$16 sps:$4 sm:$0xff]   ;;  %v2608_v9 = vld [vmem:[%s3572_s0 + $0x3e8] ss:$16 sps:$4 sm:$0xff]  }
  0x48   :  { %1501 = vmatprep.subr.bf16.mxu0 %v2520_v10  ;;  %1793 = vmatprep.subr.bf16.mxu1 %v2523_v11  ;;  %v2616_v10 = vld [vmem:[%s3572_s0 + $0x404] ss:$16 sps:$4 sm:$0xff]   ;;  %v2619_v11 = vld [vmem:[%s3572_s0 + $0x40c] ss:$16 sps:$4 sm:$0xff]  }
  0x4a   :  { %1467 = vmatmul.mubr.bf16.gmra.mrb[4].mxu0 %v2574_v17  ;;  %1759 = vmatmul.mubr.bf16.gmra.mrb[4].mxu1 %v2574_v17  ;;  %v2674_v17 = vld [vmem:[%s3573_s1 + $0x44] ss:$28 sps:$4 sm:$0xff]  }
  0x4b   :  { %1502 = vmatpush1.bf16.msra.mxu0 %v2518_v12  ;;  %1794 = vmatpush1.bf16.msra.mxu1 %v2521_v14  ;;  %v2611_v12 = vld [vmem:[%s3573_s1 + $0x8] ss:$28 sps:$4 sm:$0xff]  }
  0x4c   :  { %1503 = vmatprep.subr.bf16.mxu0 %v2526_v15  ;;  %1795 = vmatprep.subr.bf16.mxu1 %v2529_v16  ;;  %v2617_v14 = vld [vmem:[%s3572_s0 + $0x408] ss:$16 sps:$4 sm:$0xff]   ;;  %v2622_v15 = vld [vmem:[%s3572_s0 + $0x424] ss:$16 sps:$4 sm:$0xff]   ;;  %v2625_v16 = vld [vmem:[%s3572_s0 + $0x42c] ss:$16 sps:$4 sm:$0xff]  }
  0x4d   :  { %1476 = vmatprep.mubr.bf16.mxu0 %v2581_v22  ;;  %1768 = vmatprep.mubr.bf16.mxu1 %v2581_v22  ;;  %v2626_v22 = vld [vmem:[%s3572_s0 + $0x440] ss:$16 sps:$4 sm:$0xff]  }
  0x4f   :  { %1504 = vmatpush1.bf16.msra.mxu0 %v2524_v18  ;;  %1796 = vmatpush1.bf16.msra.mxu1 %v2527_v19  ;;  %v2620_v18 = vld [vmem:[%s3572_s0 + $0x420] ss:$16 sps:$4 sm:$0xff]   ;;  %v2623_v19 = vld [vmem:[%s3572_s0 + $0x428] ss:$16 sps:$4 sm:$0xff]  }
  0x50   :  { %1505 = vmatprep.subr.bf16.mxu0 %v2532_v20  ;;  %1797 = vmatprep.subr.bf16.mxu1 %v2535_v21  ;;  %v2628_v20 = vld [vmem:[%s3572_s0 + $0x444] ss:$16 sps:$4 sm:$0xff]   ;;  %v2631_v21 = vld [vmem:[%s3572_s0 + $0x44c] ss:$16 sps:$4 sm:$0xff]  }
  0x52   :  { %1477 = vmatmul.mubr.bf16.gmra.mrb[8].mxu0 %v2589_v28  ;;  %1769 = vmatmul.mubr.bf16.gmra.mrb[8].mxu1 %v2589_v28  ;;  %v2632_v28 = vld [vmem:[%s3572_s0 + $0x460] ss:$16 sps:$4 sm:$0xff]  }
  0x53   :  { %1506 = vmatpush1.bf16.msra.mxu0 %v2530_v23  ;;  %1798 = vmatpush1.bf16.msra.mxu1 %v2533_v24  ;;  %v2629_v23 = vld [vmem:[%s3572_s0 + $0x448] ss:$16 sps:$4 sm:$0xff]   ;;  %v2676_v24 = vld [vmem:[%s3573_s1 + $0x40] ss:$28 sps:$4 sm:$0xff]  }
  0x54   :  { %1507 = vmatprep.subr.bf16.mxu0 %v2538_v25  ;;  %1799 = vmatprep.subr.bf16.mxu1 %v2541_v26  ;;  %v2634_v25 = vld [vmem:[%s3572_s0 + $0x464] ss:$16 sps:$4 sm:$0xff]   ;;  %v2637_v26 = vld [vmem:[%s3572_s0 + $0x46c] ss:$16 sps:$4 sm:$0xff]  }
  0x55   :  { %1486 = vmatprep.mubr.bf16.mxu0 %v2596_v31  ;;  %1778 = vmatprep.mubr.bf16.mxu1 %v2596_v31  ;;  %v2643_v31 = vld [vmem:[%s3572_s0 + $0x48c] ss:$16 sps:$4 sm:$0xff]  }
  0x57   :  { %1508 = vmatpush1.bf16.msra.mxu0 %v2536_v27  ;;  %1800 = vmatpush1.bf16.msra.mxu1 %v2539_v29  ;;  %v2689_v27 = vld [vmem:[%s3573_s1 + $0x7c] ss:$28 sps:$4 sm:$0xff]  }
  0x58   :  { %1509 = vmatprep.subr.bf16.mxu0 %v2544_v30  ;;  %1801 = vmatprep.subr.bf16.mxu1 %v2547_v32  ;;  %v2635_v29 = vld [vmem:[%s3572_s0 + $0x468] ss:$16 sps:$4 sm:$0xff]   ;;  %v2640_v30 = vld [vmem:[%s3572_s0 + $0x484] ss:$16 sps:$4 sm:$0xff]   ;;  %v2638_v32 = vld [vmem:[%s3572_s0 + $0x480] ss:$16 sps:$4 sm:$0xff]  }
  0x5a   :  { %1487 = vmatmul.mubr.bf16.gmra.mrb[12].mxu0 %v2604_v38  ;;  %1779 = vmatmul.mubr.bf16.gmra.mrb[12].mxu1 %v2604_v38  ;;  %v2704_v38 = vld [vmem:[%s3573_s1 + $0xb4] ss:$28 sps:$4 sm:$0xff]  }
  0x5b   :  { %1510 = vmatpush1.bf16.msra.mxu0 %v2542_v33  ;;  %1802 = vmatpush1.bf16.msra.mxu1 %v2545_v34  ;;  %v2641_v33 = vld [vmem:[%s3572_s0 + $0x488] ss:$16 sps:$4 sm:$0xff]  }
  0x5c   :  { %1511 = vmatprep.subr.bf16.mxu0 %v2550_v35  ;;  %1803 = vmatprep.subr.bf16.mxu1 %v2553_v36  ;;  %v2691_v34 = vld [vmem:[%s3573_s1 + $0x78] ss:$28 sps:$4 sm:$0xff]   ;;  %v2649_v36 = vld [vmem:[%s3572_s0 + $0x4ac] ss:$16 sps:$4 sm:$0xff]  }
  0x5d   :  { %1529 = vmatprep.mubr.bf16.mxu0 %v2613_v40  ;;  %1821 = vmatprep.mubr.bf16.mxu1 %v2613_v40  ;;  %v2646_v35 = vld [vmem:[%s3572_s0 + $0x4a4] ss:$16 sps:$4 sm:$0xff]  }
  0x5e   :  { %v2652_v40 = vld [vmem:[%s3572_s0 + $0x4c4] ss:$16 sps:$4 sm:$0xff]  }
  0x5f   :  { %1512 = vmatpush1.bf16.msra.mxu0 %v2548_v37  ;;  %1804 = vmatpush1.bf16.msra.mxu1 %v2551_v39  ;;  %v2644_v37 = vld [vmem:[%s3572_s0 + $0x4a0] ss:$16 sps:$4 sm:$0xff]   ;;  %v2647_v39 = vld [vmem:[%s3572_s0 + $0x4a8] ss:$16 sps:$4 sm:$0xff]  }
  0x60   :  { %1513 = vmatprep.subr.bf16.mxu0 %v2556_v41  ;;  %1805 = vmatprep.subr.bf16.mxu1 %v2559_v42  ;;  %v2655_v41 = vld [vmem:[%s3572_s0 + $0x4cc] ss:$16 sps:$4 sm:$0xff]   ;;  %v243_v42 = vld [vmem:[%s3574_s2] sm:$0xff] }
  0x61   :  { %253 = vperm.xlu0 %2405, %v243_v42  }
  0x63   :  { %1514 = vmatpush1.bf16.msra.mxu0 %v2554_v43  ;;  %1806 = vmatpush1.bf16.msra.mxu1 %v2557_v44  ;;  %v2706_v43 = vld [vmem:[%s3573_s1 + $0xb0] ss:$28 sps:$4 sm:$0xff]  }
  0x64   :  { %1515 = vmatprep.subr.bf16.mxu0 %v2562_v45  ;;  %1807 = vmatprep.subr.bf16.mxu1 %v2565_v46  ;;  %v245_v44 = vld [vmem:[%s3574_s2 + $0x10] sm:$0xff]  ;;  %v2653_v46 = vld [vmem:[%s3572_s0 + $0x4c8] ss:$16 sps:$4 sm:$0xff]  }
  0x65   :  { %v2650_v45 = vld [vmem:[%s3572_s0 + $0x4c0] ss:$16 sps:$4 sm:$0xff]   ;;  %263 = vperm.xlu1 %2406, %v245_v44  }
  0x67   :  { %1516 = vmatpush1.bf16.msra.mxu0 %v2560_v48  ;;  %1808 = vmatpush1.bf16.msra.mxu1 %v2563_v49  ;;  %v2658_v48 = vld [vmem:[%s3572_s0 + $0x4e4] ss:$16 sps:$4 sm:$0xff]   ;;  %v2661_v49 = vld [vmem:[%s3572_s0 + $0x4ec] ss:$16 sps:$4 sm:$0xff]  }
  0x68   :  { %1517 = vmatprep.subr.bf16.mxu0 %v2570_v50  ;;  %1809 = vmatprep.subr.bf16.mxu1 %v2573_v51  ;;  %v2721_v50 = vld [vmem:[%s3573_s1 + $0x14] ss:$28 sps:$4 sm:$0xff]  }
  0x69   :  { %v2656_v51 = vld [vmem:[%s3572_s0 + $0x4e0] ss:$16 sps:$4 sm:$0xff]  }
  0x6b   :  { %1518 = vmatpush1.bf16.msra.mxu0 %v2568_v52  ;;  %1810 = vmatpush1.bf16.msra.mxu1 %v2571_v53  ;;  %v2659_v52 = vld [vmem:[%s3572_s0 + $0x4e8] ss:$16 sps:$4 sm:$0xff]  }
  0x6c   :  { %1519 = vmatprep.subr.bf16.mxu0 %v2577_v54  ;;  %1811 = vmatprep.subr.bf16.mxu1 %v2580_v55  ;;  %v244_v53 = vld [vmem:[%s3574_s2 + $0x8] sm:$0xff]  ;;  %v246_v54 = vld [vmem:[%s3574_s2 + $0x18] sm:$0xff]  ;;  %v2664_v55 = vld [vmem:[%s3572_s0 + $0x504] ss:$16 sps:$4 sm:$0xff]  }
  0x6d   :  { %258 = vperm.xlu0 %2405, %v244_v53   ;;  %268 = vperm.xlu1 %2406, %v246_v54  }
  0x6f   :  { %1520 = vmatpush1.bf16.msra.mxu0 %v2575_v56  ;;  %1812 = vmatpush1.bf16.msra.mxu1 %v2578_v57  ;;  %v2667_v56 = vld [vmem:[%s3572_s0 + $0x50c] ss:$16 sps:$4 sm:$0xff]   ;;  %v2662_v57 = vld [vmem:[%s3572_s0 + $0x500] ss:$16 sps:$4 sm:$0xff]  }
  0x70   :  { %1521 = vmatprep.subr.bf16.mxu0 %v2585_v58  ;;  %1813 = vmatprep.subr.bf16.mxu1 %v2588_v59  ;;  %v2665_v58 = vld [vmem:[%s3572_s0 + $0x508] ss:$16 sps:$4 sm:$0xff]  }
  0x71   :  { %v248_v59 = vld [vmem:[%s3574_s2 + $0x28] sm:$0xff] }
  0x72   :  { %278 = vperm.xlu1 %2406, %v248_v59  }
  0x73   :  { %1522 = vmatpush1.bf16.msra.mxu0 %v2583_v60  ;;  %1814 = vmatpush1.bf16.msra.mxu1 %v2586_v61  ;;  %v247_v60 = vld [vmem:[%s3574_s2 + $0x20] sm:$0xff] }
  0x74   :  { %1523 = vmatprep.subr.bf16.mxu0 %v2592_v62  ;;  %1815 = vmatprep.subr.bf16.mxu1 %v2595_v63  ;;  %v2670_v61 = vld [vmem:[%s3572_s0 + $0x524] ss:$16 sps:$4 sm:$0xff]   ;;  %v2673_v62 = vld [vmem:[%s3572_s0 + $0x52c] ss:$16 sps:$4 sm:$0xff]   ;;  %v2668_v63 = vld [vmem:[%s3572_s0 + $0x520] ss:$16 sps:$4 sm:$0xff]  }
  0x75   :  { %273 = vperm.xlu0 %2405, %v247_v60  }
  0x77   :  { %1524 = vmatpush1.bf16.msra.mxu0 %v2590_v0  ;;  %1816 = vmatpush1.bf16.msra.mxu1 %v2593_v1  ;;  %v2671_v0 = vld [vmem:[%s3572_s0 + $0x528] ss:$16 sps:$4 sm:$0xff]  }
  0x78   :  { %1525 = vmatprep.subr.bf16.mxu0 %v2600_v2  ;;  %1817 = vmatprep.subr.bf16.mxu1 %v2603_v3  ;;  %v250_v1 = vld [vmem:[%s3574_s2 + $0x38] sm:$0xff]  ;;  %v249_v2 = vld [vmem:[%s3574_s2 + $0x30] sm:$0xff] }
  0x79   :  { %v2679_v3 = vld [vmem:[%s3572_s0 + $0x544] ss:$16 sps:$4 sm:$0xff]   ;;  %288 = vperm.xlu1 %2406, %v250_v1   ;;  %283 = vperm.xlu0 %2405, %v249_v2  }
  0x7b   :  { %1526 = vmatpush1.bf16.msra.mxu0 %v2598_v4  ;;  %1818 = vmatpush1.bf16.msra.mxu1 %v2601_v5  ;;  %v2682_v4 = vld [vmem:[%s3572_s0 + $0x54c] ss:$16 sps:$4 sm:$0xff]   ;;  %v2677_v5 = vld [vmem:[%s3572_s0 + $0x540] ss:$16 sps:$4 sm:$0xff]  }
  0x7c   :  { %1527 = vmatprep.subr.bf16.mxu0 %v2607_v6  ;;  %1819 = vmatprep.subr.bf16.mxu1 %v2610_v7  ;;  %v2680_v6 = vld [vmem:[%s3572_s0 + $0x548] ss:$16 sps:$4 sm:$0xff]   ;;  %v2685_v7 = vld [vmem:[%s3572_s0 + $0x564] ss:$16 sps:$4 sm:$0xff]  }
  0x7f   :  { %1528 = vmatpush1.bf16.msra.mxu0 %v2605_v8  ;;  %1820 = vmatpush1.bf16.msra.mxu1 %v2608_v9  ;;  %v2688_v8 = vld [vmem:[%s3572_s0 + $0x56c] ss:$16 sps:$4 sm:$0xff]   ;;  %v2683_v9 = vld [vmem:[%s3572_s0 + $0x560] ss:$16 sps:$4 sm:$0xff]  }
  0x80   :  { %1570 = vmatprep.subr.bf16.mxu0 %v2616_v10  ;;  %1862 = vmatprep.subr.bf16.mxu1 %v2619_v11  ;;  %v2686_v10 = vld [vmem:[%s3572_s0 + $0x568] ss:$16 sps:$4 sm:$0xff]   ;;  %v2694_v11 = vld [vmem:[%s3572_s0 + $0x584] ss:$16 sps:$4 sm:$0xff]  }
  0x82   :  { %1530 = vmatmul.mubr.bf16.vlgmr.msra.gmra.mrb[0].mxu0 %v2611_v12  ;;  %1822 = vmatmul.mubr.bf16.vlgmr.msra.gmra.mrb[0].mxu1 %v2611_v12  ;;  %v2697_v12 = vld [vmem:[%s3572_s0 + $0x58c] ss:$16 sps:$4 sm:$0xff]  }
  0x83   :  { %1571 = vmatpush1.bf16.msra.mxu0 %v2614_v13  ;;  %1863 = vmatpush1.bf16.msra.mxu1 %v2617_v14  ;;  %v2692_v13 = vld [vmem:[%s3572_s0 + $0x580] ss:$16 sps:$4 sm:$0xff]   ;;  %v2695_v14 = vld [vmem:[%s3572_s0 + $0x588] ss:$16 sps:$4 sm:$0xff]  }
  0x84   :  { %1572 = vmatprep.subr.bf16.mxu0 %v2622_v15  ;;  %1864 = vmatprep.subr.bf16.mxu1 %v2625_v16  ;;  %v2700_v15 = vld [vmem:[%s3572_s0 + $0x5a4] ss:$16 sps:$4 sm:$0xff]   ;;  %v2703_v16 = vld [vmem:[%s3572_s0 + $0x5ac] ss:$16 sps:$4 sm:$0xff]  }
  0x85   :  { %1539 = vmatprep.mubr.bf16.mxu0 %v2674_v17  ;;  %1831 = vmatprep.mubr.bf16.mxu1 %v2674_v17  ;;  %v2698_v17 = vld [vmem:[%s3572_s0 + $0x5a0] ss:$16 sps:$4 sm:$0xff]  }
  0x87   :  { %1573 = vmatpush1.bf16.msra.mxu0 %v2620_v18  ;;  %1865 = vmatpush1.bf16.msra.mxu1 %v2623_v19  ;;  %v2701_v18 = vld [vmem:[%s3572_s0 + $0x5a8] ss:$16 sps:$4 sm:$0xff]   ;;  %v2709_v19 = vld [vmem:[%s3572_s0 + $0x5c4] ss:$16 sps:$4 sm:$0xff]  }
  0x88   :  { %1574 = vmatprep.subr.bf16.mxu0 %v2628_v20  ;;  %1866 = vmatprep.subr.bf16.mxu1 %v2631_v21  ;;  %v2712_v20 = vld [vmem:[%s3572_s0 + $0x5cc] ss:$16 sps:$4 sm:$0xff]   ;;  %v2707_v21 = vld [vmem:[%s3572_s0 + $0x5c0] ss:$16 sps:$4 sm:$0xff]  }
  0x8a   :  { %1540 = vmatmul.mubr.bf16.gmra.mrb[4].mxu0 %v2676_v24  ;;  %1832 = vmatmul.mubr.bf16.gmra.mrb[4].mxu1 %v2676_v24  ;;  %v2718_v24 = vld [vmem:[%s3572_s0 + $0x5ec] ss:$16 sps:$4 sm:$0xff]  }
  0x8b   :  { %1575 = vmatpush1.bf16.msra.mxu0 %v2626_v22  ;;  %1867 = vmatpush1.bf16.msra.mxu1 %v2629_v23  ;;  %v2710_v22 = vld [vmem:[%s3572_s0 + $0x5c8] ss:$16 sps:$4 sm:$0xff]   ;;  %v2715_v23 = vld [vmem:[%s3572_s0 + $0x5e4] ss:$16 sps:$4 sm:$0xff]  }
  0x8c   :  { %1576 = vmatprep.subr.bf16.mxu0 %v2634_v25  ;;  %1868 = vmatprep.subr.bf16.mxu1 %v2637_v26  ;;  %v2713_v25 = vld [vmem:[%s3572_s0 + $0x5e0] ss:$16 sps:$4 sm:$0xff]   ;;  %v2716_v26 = vld [vmem:[%s3572_s0 + $0x5e8] ss:$16 sps:$4 sm:$0xff]  }
  0x8d   :  { %1549 = vmatprep.mubr.bf16.mxu0 %v2689_v27  ;;  %1841 = vmatprep.mubr.bf16.mxu1 %v2689_v27  ;;  %v2724_v27 = vld [vmem:[%s3572_s0 + $0x604] ss:$16 sps:$4 sm:$0xff]  }
  0x8f   :  { %1577 = vmatpush1.bf16.msra.mxu0 %v2632_v28  ;;  %1869 = vmatpush1.bf16.msra.mxu1 %v2635_v29  ;;  %v2727_v28 = vld [vmem:[%s3572_s0 + $0x60c] ss:$16 sps:$4 sm:$0xff]  }
  0x90   :  { %1578 = vmatprep.subr.bf16.mxu0 %v2640_v30  ;;  %1870 = vmatprep.subr.bf16.mxu1 %v2643_v31  ;;  %v2719_v29 = vld [vmem:[%s3573_s1 + $0x10] ss:$28 sps:$4 sm:$0xff]   ;;  %v2725_v31 = vld [vmem:[%s3572_s0 + $0x608] ss:$16 sps:$4 sm:$0xff]  }
  0x91   :  { %v2722_v30 = vld [vmem:[%s3572_s0 + $0x600] ss:$16 sps:$4 sm:$0xff]  }
  0x92   :  { %1550 = vmatmul.mubr.bf16.gmra.mrb[8].mxu0 %v2691_v34  ;;  %1842 = vmatmul.mubr.bf16.gmra.mrb[8].mxu1 %v2691_v34  ;;  %v2731_v34 = vld [vmem:[%s3573_s1 + $0x84] ss:$28 sps:$4 sm:$0xff]  }
  0x93   :  { %1579 = vmatpush1.bf16.msra.mxu0 %v2638_v32  ;;  %1871 = vmatpush1.bf16.msra.mxu1 %v2641_v33  ;;  %v2728_v32 = vld [vmem:[%s3573_s1 + $0x4c] ss:$28 sps:$4 sm:$0xff]  }
  0x94   :  { %1580 = vmatprep.subr.bf16.mxu0 %v2646_v35  ;;  %1872 = vmatprep.subr.bf16.mxu1 %v2649_v36  ;;  %v2730_v33 = vld [vmem:[%s3573_s1 + $0x48] ss:$28 sps:$4 sm:$0xff]   ;;  %v2733_v35 = vld [vmem:[%s3573_s1 + $0x80] ss:$28 sps:$4 sm:$0xff]  }
  0x95   :  { %1559 = vmatprep.mubr.bf16.mxu0 %v2704_v38  ;;  %1851 = vmatprep.mubr.bf16.mxu1 %v2704_v38  ;;  %v2734_v36 = vld [vmem:[%s3573_s1 + $0xbc] ss:$28 sps:$4 sm:$0xff]  }
  0x96   :  { %v2737_v38 = vld [vmem:[%s3573_s1 + $0x18] ss:$28 sps:$4 sm:$0xff]  }
  0x97   :  { %1581 = vmatpush1.bf16.msra.mxu0 %v2644_v37  ;;  %1873 = vmatpush1.bf16.msra.mxu1 %v2647_v39  ;;  %v2736_v37 = vld [vmem:[%s3573_s1 + $0xb8] ss:$28 sps:$4 sm:$0xff]   ;;  %v2738_v39 = vld [vmem:[%s3573_s1 + $0x50] ss:$28 sps:$4 sm:$0xff]  }
  0x98   :  { %1582 = vmatprep.subr.bf16.mxu0 %v2652_v40  ;;  %1874 = vmatprep.subr.bf16.mxu1 %v2655_v41  ;;  %v2739_v40 = vld [vmem:[%s3573_s1 + $0x88] ss:$28 sps:$4 sm:$0xff]   ;;  %v2740_v41 = vld [vmem:[%s3573_s1 + $0xc0] ss:$28 sps:$4 sm:$0xff]  }
  0x9a   :  { %1560 = vmatmul.mubr.bf16.gmra.mrb[12].mxu0 %v2706_v43  ;;  %1852 = vmatmul.mubr.bf16.gmra.mrb[12].mxu1 %v2706_v43 }
  0x9b   :  { %1583 = vmatpush1.bf16.msra.mxu0 %v2650_v45  ;;  %1875 = vmatpush1.bf16.msra.mxu1 %v2653_v46 }
  0x9c   :  { %1584 = vmatprep.subr.bf16.mxu0 %v2658_v48  ;;  %1876 = vmatprep.subr.bf16.mxu1 %v2661_v49 }
  0x9d   :  { %1602 = vmatprep.mubr.bf16.mxu0 %v2721_v50  ;;  %1894 = vmatprep.mubr.bf16.mxu1 %v2721_v50 }
  0x9f   :  { %1585 = vmatpush1.bf16.msra.mxu0 %v2656_v51  ;;  %1877 = vmatpush1.bf16.msra.mxu1 %v2659_v52 }
  0xa0   :  { %1586 = vmatprep.subr.bf16.mxu0 %v2664_v55  ;;  %1878 = vmatprep.subr.bf16.mxu1 %v2667_v56 }
  0xa3   :  { %1587 = vmatpush1.bf16.msra.mxu0 %v2662_v57  ;;  %1879 = vmatpush1.bf16.msra.mxu1 %v2665_v58 }
  0xa4   :  { %1588 = vmatprep.subr.bf16.mxu0 %v2670_v61  ;;  %1880 = vmatprep.subr.bf16.mxu1 %v2673_v62 }
  0xa7   :  { %1589 = vmatpush1.bf16.msra.mxu0 %v2668_v63  ;;  %1881 = vmatpush1.bf16.msra.mxu1 %v2671_v0 }
  0xa8   :  { %1590 = vmatprep.subr.bf16.mxu0 %v2679_v3  ;;  %1882 = vmatprep.subr.bf16.mxu1 %v2682_v4 }
  0xab   :  { %1591 = vmatpush1.bf16.msra.mxu0 %v2677_v5  ;;  %1883 = vmatpush1.bf16.msra.mxu1 %v2680_v6 }
  0xac   :  { %1592 = vmatprep.subr.bf16.mxu0 %v2685_v7  ;;  %1884 = vmatprep.subr.bf16.mxu1 %v2688_v8 }
  0xaf   :  { %1593 = vmatpush1.bf16.msra.mxu0 %v2683_v9  ;;  %1885 = vmatpush1.bf16.msra.mxu1 %v2686_v10 }
  0xb0   :  { %1594 = vmatprep.subr.bf16.mxu0 %v2694_v11  ;;  %1886 = vmatprep.subr.bf16.mxu1 %v2697_v12 }
  0xb3   :  { %1595 = vmatpush1.bf16.msra.mxu0 %v2692_v13  ;;  %1887 = vmatpush1.bf16.msra.mxu1 %v2695_v14 }
  0xb4   :  { %1596 = vmatprep.subr.bf16.mxu0 %v2700_v15  ;;  %1888 = vmatprep.subr.bf16.mxu1 %v2703_v16 }
  0xb7   :  { %1597 = vmatpush1.bf16.msra.mxu0 %v2698_v17  ;;  %1889 = vmatpush1.bf16.msra.mxu1 %v2701_v18 }
  0xb8   :  { %1598 = vmatprep.subr.bf16.mxu0 %v2709_v19  ;;  %1890 = vmatprep.subr.bf16.mxu1 %v2712_v20 }
  0xbb   :  { %1599 = vmatpush1.bf16.msra.mxu0 %v2707_v21  ;;  %1891 = vmatpush1.bf16.msra.mxu1 %v2710_v22 }
  0xbc   :  { %1600 = vmatprep.subr.bf16.mxu0 %v2715_v23  ;;  %1892 = vmatprep.subr.bf16.mxu1 %v2718_v24 }
  0xbf   :  { %1601 = vmatpush1.bf16.msra.mxu0 %v2713_v25  ;;  %1893 = vmatpush1.bf16.msra.mxu1 %v2716_v26 }
  0xc0   :  { %1643 = vmatprep.subr.bf16.mxu0 %v2724_v27  ;;  %1935 = vmatprep.subr.bf16.mxu1 %v2727_v28 }
  0xc2   :  { %1603 = vmatmul.mubr.bf16.vlgmr.msra.gmra.mrb[0].mxu0 %v2719_v29  ;;  %1895 = vmatmul.mubr.bf16.vlgmr.msra.gmra.mrb[0].mxu1 %v2719_v29 }
  0xc3   :  { %1644 = vmatpush1.bf16.msra.mxu0 %v2722_v30  ;;  %1936 = vmatpush1.bf16.msra.mxu1 %v2725_v31 }
  0xc4   :  { %1612 = vmatprep.mubr.bf16.mxu0 %v2728_v32  ;;  %1904 = vmatprep.mubr.bf16.mxu1 %v2728_v32 }
  0xca   :  { %1613 = vmatmul.mubr.bf16.gmra.mrb[4].mxu0 %v2730_v33  ;;  %1905 = vmatmul.mubr.bf16.gmra.mrb[4].mxu1 %v2730_v33 }
  0xcb   :  { %1622 = vmatprep.mubr.bf16.mxu0 %v2731_v34  ;;  %1914 = vmatprep.mubr.bf16.mxu1 %v2731_v34 }
  0xd2   :  { %1623 = vmatmul.mubr.bf16.gmra.mrb[8].mxu0 %v2733_v35  ;;  %1915 = vmatmul.mubr.bf16.gmra.mrb[8].mxu1 %v2733_v35 }
  0xd3   :  { %1632 = vmatprep.mubr.bf16.mxu0 %v2734_v36  ;;  %1924 = vmatprep.mubr.bf16.mxu1 %v2734_v36 }
  0xda   :  { %1633 = vmatmul.mubr.bf16.gmra.mrb[12].mxu0 %v2736_v37  ;;  %1925 = vmatmul.mubr.bf16.gmra.mrb[12].mxu1 %v2736_v37 }
  0xdb   :  { %1675 = vmatprep.mubr.bf16.mxu0 %v2741_v47  ;;  %1967 = vmatprep.mubr.bf16.mxu1 %v2741_v47 }
  0xe0   :  { %v254_v42 = vpop.permute.xlu0 %253 }
  0xe2   :  { %2268 = vmatmul.mubr.msk.bf16.vlgmr.msra.gmra.mrb[0].mxu0 %vm1411_vm0, %v2737_v38  ;;  %2272 = vmatmul.mubr.msk.bf16.vlgmr.msra.gmra.mrb[0].mxu1 %vm1411_vm0, %v2737_v38 }
  0xe3   :  { %1685 = vmatprep.mubr.bf16.mxu0 %v2741_v47  ;;  %1977 = vmatprep.mubr.bf16.mxu1 %v2741_v47 }
  0xe4   :  { %v264_v44 = vpop.permute.xlu1 %263 }
  0xea   :  { %2269 = vmatmul.mubr.msk.bf16.gmra.mrb[4].mxu0 %vm1411_vm0, %v2738_v39  ;;  %2273 = vmatmul.mubr.msk.bf16.gmra.mrb[4].mxu1 %vm1411_vm0, %v2738_v39 }
  0xeb   :  { %1695 = vmatprep.mubr.bf16.mxu0 %v2741_v47  ;;  %1987 = vmatprep.mubr.bf16.mxu1 %v2741_v47 }
  0xec   :  { %v259_v43 = vpop.permute.xlu0 %258  ;;  %v269_v61 = vpop.permute.xlu1 %268 }
  0xf1   :  { %v279_v14 = vpop.permute.xlu1 %278 }
  0xf2   :  { %2270 = vmatmul.mubr.msk.bf16.gmra.mrb[8].mxu0 %vm1411_vm0, %v2739_v40  ;;  %2274 = vmatmul.mubr.msk.bf16.gmra.mrb[8].mxu1 %vm1411_vm0, %v2739_v40 }
  0xf3   :  { %1705 = vmatprep.mubr.bf16.mxu0 %v2741_v47  ;;  %1997 = vmatprep.mubr.bf16.mxu1 %v2741_v47 }
  0xf4   :  { %v274_v15 = vpop.permute.xlu0 %273 }
  0xf8   :  { %v289_v32 = vpop.permute.xlu1 %288  ;;  %v284_v33 = vpop.permute.xlu0 %283 }
  0xfa   :  { %2271 = vmatmul.mubr.msk.bf16.gmra.mrb[12].mxu0 %vm1411_vm0, %v2740_v41  ;;  %2275 = vmatmul.mubr.msk.bf16.gmra.mrb[12].mxu1 %vm1411_vm0, %v2740_v41 }
 0x1b5   :  { %v1677_v45 = vpop.f32.mrb[0].mxu0  ;;  %v1969_v46 = vpop.f32.mrb[0].mxu1 }
 0x1b6   :  { %v2276_v48 = vadd.f32 %v1677_v45, %v254_v42  ;;  %v2292_v49 = vadd.f32 %v1969_v46, %v254_v42  ;;  %v1679_v50 = vpop.f32.mrb[1].mxu0  ;;  %v1971_v51 = vpop.f32.mrb[1].mxu1 }
 0x1b7   :  { %v2277_v52 = vadd.f32 %v1679_v50, %v254_v42  ;;  %v2293_v53 = vadd.f32 %v1971_v51, %v254_v42  ;;  %v1681_v47 = vpop.f32.mrb[2].mxu0  ;;  %v1973_v54 = vpop.f32.mrb[2].mxu1 }
 0x1b8   :  { %2008 = vst [vmem:[%s3575_s3] sm:$0xff] %v2276_v48  ;;  %2010 = vst [vmem:[%s3575_s3 + $0x10] sm:$0xff] %v2292_v49  ;;  %v2278_v55 = vadd.f32 %v1681_v47, %v259_v43  ;;  %v2294_v56 = vadd.f32 %v1973_v54, %v259_v43  ;;  %v1683_v57 = vpop.f32.mrb[3].mxu0  ;;  %v1975_v58 = vpop.f32.mrb[3].mxu1 }
 0x1b9   :  { %2009 = vst [vmem:[%s3575_s3 + $0x8] sm:$0xff] %v2277_v52  ;;  %2011 = vst [vmem:[%s3575_s3 + $0x18] sm:$0xff] %v2293_v53  ;;  %v2279_v59 = vadd.f32 %v1683_v57, %v259_v43  ;;  %v2295_v60 = vadd.f32 %v1975_v58, %v259_v43 }
 0x1ba   :  { %2012 = vst [vmem:[%s3575_s3 + $0x20] sm:$0xff] %v2278_v55  ;;  %2014 = vst [vmem:[%s3575_s3 + $0x30] sm:$0xff] %v2294_v56 }
 0x1bb   :  { %2013 = vst [vmem:[%s3575_s3 + $0x28] sm:$0xff] %v2279_v59  ;;  %2015 = vst [vmem:[%s3575_s3 + $0x38] sm:$0xff] %v2295_v60 }
 0x1bd   :  { %v1687_v62 = vpop.f32.mrb[4].mxu0  ;;  %v1979_v63 = vpop.f32.mrb[4].mxu1 }
 0x1be   :  { %v2280_v0 = vadd.f32 %v1687_v62, %v264_v44  ;;  %v2296_v1 = vadd.f32 %v1979_v63, %v264_v44  ;;  %v1689_v2 = vpop.f32.mrb[5].mxu0  ;;  %v1981_v3 = vpop.f32.mrb[5].mxu1 }
 0x1bf   :  { %v2281_v4 = vadd.f32 %v1689_v2, %v264_v44  ;;  %v2297_v5 = vadd.f32 %v1981_v3, %v264_v44  ;;  %v1691_v6 = vpop.f32.mrb[6].mxu0  ;;  %v1983_v7 = vpop.f32.mrb[6].mxu1 }
 0x1c0   :  { %2016 = vst [vmem:[%s3575_s3 + $0x40] sm:$0xff] %v2280_v0  ;;  %2018 = vst [vmem:[%s3575_s3 + $0x50] sm:$0xff] %v2296_v1  ;;  %v2282_v8 = vadd.f32 %v1691_v6, %v269_v61  ;;  %v2298_v9 = vadd.f32 %v1983_v7, %v269_v61  ;;  %v1693_v10 = vpop.f32.mrb[7].mxu0  ;;  %v1985_v11 = vpop.f32.mrb[7].mxu1 }
 0x1c1   :  { %2017 = vst [vmem:[%s3575_s3 + $0x48] sm:$0xff] %v2281_v4  ;;  %2019 = vst [vmem:[%s3575_s3 + $0x58] sm:$0xff] %v2297_v5  ;;  %v2283_v12 = vadd.f32 %v1693_v10, %v269_v61  ;;  %v2299_v13 = vadd.f32 %v1985_v11, %v269_v61 }
 0x1c2   :  { %2020 = vst [vmem:[%s3575_s3 + $0x60] sm:$0xff] %v2282_v8  ;;  %2022 = vst [vmem:[%s3575_s3 + $0x70] sm:$0xff] %v2298_v9 }
 0x1c3   :  { %2021 = vst [vmem:[%s3575_s3 + $0x68] sm:$0xff] %v2283_v12  ;;  %2023 = vst [vmem:[%s3575_s3 + $0x78] sm:$0xff] %v2299_v13 }
 0x1c5   :  { %v1697_v16 = vpop.f32.mrb[8].mxu0  ;;  %v1989_v17 = vpop.f32.mrb[8].mxu1 }
 0x1c6   :  { %v2284_v18 = vadd.f32 %v1697_v16, %v274_v15  ;;  %v2300_v19 = vadd.f32 %v1989_v17, %v274_v15  ;;  %v1699_v20 = vpop.f32.mrb[9].mxu0  ;;  %v1991_v21 = vpop.f32.mrb[9].mxu1 }
 0x1c7   :  { %v2285_v22 = vadd.f32 %v1699_v20, %v274_v15  ;;  %v2301_v23 = vadd.f32 %v1991_v21, %v274_v15  ;;  %v1701_v24 = vpop.f32.mrb[10].mxu0  ;;  %v1993_v25 = vpop.f32.mrb[10].mxu1 }
 0x1c8   :  { %2024 = vst [vmem:[%s3575_s3 + $0x80] sm:$0xff] %v2284_v18  ;;  %2026 = vst [vmem:[%s3575_s3 + $0x90] sm:$0xff] %v2300_v19  ;;  %v2286_v26 = vadd.f32 %v1701_v24, %v279_v14  ;;  %v2302_v27 = vadd.f32 %v1993_v25, %v279_v14  ;;  %v1703_v28 = vpop.f32.mrb[11].mxu0  ;;  %v1995_v29 = vpop.f32.mrb[11].mxu1 }
 0x1c9   :  { %2025 = vst [vmem:[%s3575_s3 + $0x88] sm:$0xff] %v2285_v22  ;;  %2027 = vst [vmem:[%s3575_s3 + $0x98] sm:$0xff] %v2301_v23  ;;  %v2287_v30 = vadd.f32 %v1703_v28, %v279_v14  ;;  %v2303_v31 = vadd.f32 %v1995_v29, %v279_v14 }
 0x1ca   :  { %2028 = vst [vmem:[%s3575_s3 + $0xa0] sm:$0xff] %v2286_v26  ;;  %2030 = vst [vmem:[%s3575_s3 + $0xb0] sm:$0xff] %v2302_v27 }
 0x1cb   :  { %2029 = vst [vmem:[%s3575_s3 + $0xa8] sm:$0xff] %v2287_v30  ;;  %2031 = vst [vmem:[%s3575_s3 + $0xb8] sm:$0xff] %v2303_v31 }
 0x1cd   :  { %v1707_v34 = vpop.f32.mrb[12].mxu0  ;;  %v1999_v35 = vpop.f32.mrb[12].mxu1 }
 0x1ce   :  { %v2288_v36 = vadd.f32 %v1707_v34, %v284_v33  ;;  %v2304_v37 = vadd.f32 %v1999_v35, %v284_v33  ;;  %v1709_v38 = vpop.f32.mrb[13].mxu0  ;;  %v2001_v39 = vpop.f32.mrb[13].mxu1 }
 0x1cf   :  { %v2289_v40 = vadd.f32 %v1709_v38, %v284_v33  ;;  %v2305_v41 = vadd.f32 %v2001_v39, %v284_v33  ;;  %v1711_v42 = vpop.f32.mrb[14].mxu0  ;;  %v2003_v43 = vpop.f32.mrb[14].mxu1 }
 0x1d0   :  { %2032 = vst [vmem:[%s3575_s3 + $0xc0] sm:$0xff] %v2288_v36  ;;  %2034 = vst [vmem:[%s3575_s3 + $0xd0] sm:$0xff] %v2304_v37  ;;  %v2290_v44 = vadd.f32 %v1711_v42, %v289_v32  ;;  %v2306_v45 = vadd.f32 %v2003_v43, %v289_v32  ;;  %v1713_v46 = vpop.f32.mrb[15].mxu0  ;;  %v2005_v48 = vpop.f32.mrb[15].mxu1 }
 0x1d1   :  { %2033 = vst [vmem:[%s3575_s3 + $0xc8] sm:$0xff] %v2289_v40  ;;  %2035 = vst [vmem:[%s3575_s3 + $0xd8] sm:$0xff] %v2305_v41  ;;  %v2291_v49 = vadd.f32 %v1713_v46, %v289_v32  ;;  %v2307_v50 = vadd.f32 %v2005_v48, %v289_v32 }
 0x1d2   :  { %2036 = vst [vmem:[%s3575_s3 + $0xe0] sm:$0xff] %v2290_v44  ;;  %2038 = vst [vmem:[%s3575_s3 + $0xf0] sm:$0xff] %v2306_v45 }
 0x1d3   :  { %2037 = vst [vmem:[%s3575_s3 + $0xe8] sm:$0xff] %v2291_v49  ;;  %2039 = vst [vmem:[%s3575_s3 + $0xf8] sm:$0xff] %v2307_v50 }

</bundles_post_ra>
